<compile_context>
chip_gen: v6e
topology: v6e:2x2x1
jax: 0.10.0
libtpu: 0.0.40
codegen_flags: <defaults>
</compile_context>

<pallas_src>
import functools

import jax
import jax.numpy as jnp
from jax import lax
from jax.experimental import pallas as pl
from jax.experimental.pallas import tpu as pltpu


def _attention_kernel(x_ref, wq_ref, wk_ref, wv_ref, wproj_ref, bias_ref, o_ref, *,
                      num_heads, seq_len, dim):
    """One batch element: per-head Q/K/V projections, softmax attention, and
    per-head output-projection accumulation into the resident output block."""
    xb = x_ref[0]                                           # (N, C) bf16, read from VMEM once

    # Fold the bias add into the accumulator init (hoisted out of the head loop).
    o_ref[0] = jnp.broadcast_to(bias_ref[...], (seq_len, dim))          # (N, C) f32

    @pl.loop(0, num_heads)
    def _(h):
        # Per-head projections: (N, C) x (C, d) MXU matmuls, f32 accumulate.
        # Leading-axis ref index -> contiguous per-head weight slab, no lane slicing.
        q = jnp.dot(xb, wq_ref[h], preferred_element_type=jnp.float32)  # (N, d); scale pre-folded
        k = jnp.dot(xb, wk_ref[h], preferred_element_type=jnp.float32)  # (N, d)
        v = jnp.dot(xb, wv_ref[h], preferred_element_type=jnp.float32)  # (N, d)

        # scores = q @ k^T : contract last dims of both operands (no explicit transpose).
        s = lax.dot_general(q.astype(jnp.bfloat16), k.astype(jnp.bfloat16),
                            (((1,), (1,)), ((), ())),
                            preferred_element_type=jnp.float32)         # (N, N) f32

        # Softmax in f32 (portable: v5e has no bf16 VPU/EUP path); divide -> EUP reciprocal.
        s = s - jnp.max(s, axis=-1, keepdims=True)
        p = jnp.exp(s)
        inv = pl.reciprocal(jnp.sum(p, axis=-1, keepdims=True), approx=True)
        p = (p * inv).astype(jnp.bfloat16)                              # bf16 probs for MXU

        oh = jnp.dot(p, v.astype(jnp.bfloat16),
                     preferred_element_type=jnp.float32)                # (N, d) f32

        # Per-head slice of the output projection (head-major rows), accumulated
        # directly into the output block (replaces concat + full-width projection).
        o_ref[0] += jnp.dot(oh.astype(jnp.bfloat16), wproj_ref[h],
                            preferred_element_type=jnp.float32)         # (N, C) f32


def rest_attention_pallas(x, wq, wkv, wproj, bproj, num_heads):
    """x: (B, N, C) float32. Weights follow torch.nn.Linear convention (out, in)."""
    B, N, C = x.shape
    d = C // num_heads
    scale = d ** -0.5

    # --- JAX-side weight preparation (pure glue): head-major weight stacks ---
    # Q projection with the softmax scale folded in.
    Wq = jnp.transpose((wq.T * scale).reshape(C, num_heads, d), (1, 0, 2))   # (H, C, d)
    WkvT = wkv.T.reshape(C, 2, num_heads, d)                                 # (C, 2, H, d)
    Wk = jnp.transpose(WkvT[:, 0], (1, 0, 2))                                # (H, C, d)
    Wv = jnp.transpose(WkvT[:, 1], (1, 0, 2))                                # (H, C, d)
    # Output projection rows grouped per head: ctx @ wproj.T == sum_h oh @ Wp[h].
    Wp = wproj.T.reshape(num_heads, d, C)                                    # (H, d, C)

    Wq = Wq.astype(jnp.bfloat16)
    Wk = Wk.astype(jnp.bfloat16)
    Wv = Wv.astype(jnp.bfloat16)
    Wp = Wp.astype(jnp.bfloat16)
    bias = bproj.reshape(1, C).astype(jnp.float32)
    xb = x.astype(jnp.bfloat16)

    kernel = functools.partial(_attention_kernel, num_heads=num_heads, seq_len=N, dim=C)

    out = pl.pallas_call(
        kernel,
        out_shape=jax.ShapeDtypeStruct((B, N, C), jnp.float32),
        grid_spec=pltpu.PrefetchScalarGridSpec(
            num_scalar_prefetch=0,
            grid=(B,),
            in_specs=[
                pl.BlockSpec((1, N, C), lambda b: (b, 0, 0)),            # x (per batch)
                pl.BlockSpec((num_heads, C, d), lambda b: (0, 0, 0)),    # Wq (head-major, scaled)
                pl.BlockSpec((num_heads, C, d), lambda b: (0, 0, 0)),    # Wk (head-major)
                pl.BlockSpec((num_heads, C, d), lambda b: (0, 0, 0)),    # Wv (head-major)
                pl.BlockSpec((num_heads, d, C), lambda b: (0, 0, 0)),    # Wproj (head-major rows)
                pl.BlockSpec((1, C), lambda b: (0, 0)),                  # out-proj bias
            ],
            out_specs=pl.BlockSpec((1, N, C), lambda b: (b, 0, 0)),
        ),
        compiler_params=pltpu.CompilerParams(
            dimension_semantics=("parallel",),
        ),
    )(xb, Wq, Wk, Wv, Wp, bias)
    return out


def rest_attention_ref(x, wq, wkv, wproj, bproj, num_heads):
    """Pure-JAX f32 reference mirroring the PyTorch forward (sr_ratio=1, no transform)."""
    B, N, C = x.shape
    d = C // num_heads
    scale = d ** -0.5

    q = (x @ wq.T).reshape(B, N, num_heads, d).transpose(0, 2, 1, 3)         # (B,H,N,d)
    kv = (x @ wkv.T).reshape(B, N, 2, num_heads, d).transpose(2, 0, 3, 1, 4)
    k, v = kv[0], kv[1]                                                       # (B,H,N,d)

    attn = jnp.einsum("bhnd,bhmd->bhnm", q, k) * scale
    attn = jax.nn.softmax(attn, axis=-1)
    out = jnp.einsum("bhnm,bhmd->bhnd", attn, v)
    out = out.transpose(0, 2, 1, 3).reshape(B, N, C)
    return out @ wproj.T + bproj


if __name__ == "__main__":
    B, Hs, Ws, C, num_heads = 2, 8, 8, 32, 4
    N = Hs * Ws

    key = jax.random.PRNGKey(0)
    k_x, k_q, k_kv, k_p, k_b = jax.random.split(key, 5)

    x = jax.random.normal(k_x, (B, N, C), dtype=jnp.float32)
    # nn.Linear weights: (out_features, in_features); q/kv have no bias (qkv_bias=False).
    wq = jax.random.normal(k_q, (C, C), dtype=jnp.float32) * 0.05
    wkv = jax.random.normal(k_kv, (2 * C, C), dtype=jnp.float32) * 0.05
    wproj = jax.random.normal(k_p, (C, C), dtype=jnp.float32) * 0.05
    bproj = jax.random.normal(k_b, (C,), dtype=jnp.float32) * 0.05

    out = rest_attention_pallas(x, wq, wkv, wproj, bproj, num_heads)
    out = jax.block_until_ready(out)

    ref = rest_attention_ref(x, wq, wkv, wproj, bproj, num_heads)
    assert out.shape == (B, N, C)
    # bf16 matmul inputs (f32 accumulate) + approx reciprocal -> relaxed tolerance vs f32 reference.
    assert jnp.allclose(out, ref, atol=3e-2, rtol=3e-2), (
        f"max abs err {jnp.max(jnp.abs(out - ref))}"
    )
    print("KERNEL_OK")
</pallas_src>

<mosaic_0001>
module attributes {stable_mosaic.version = 11 : i64} {
  func.func @_attention_kernel(%arg0: i32, %arg1: memref<1x64x32xbf16, #tpu.memory_space<vmem>>, %arg2: memref<4x32x8xbf16, #tpu.memory_space<vmem>>, %arg3: memref<4x32x8xbf16, #tpu.memory_space<vmem>>, %arg4: memref<4x32x8xbf16, #tpu.memory_space<vmem>>, %arg5: memref<4x8x32xbf16, #tpu.memory_space<vmem>>, %arg6: memref<1x32xf32, #tpu.memory_space<vmem>>, %arg7: memref<1x64x32xf32, #tpu.memory_space<vmem>>) attributes {dimension_semantics = [#tpu.dimension_semantics<parallel>], iteration_bounds = array<i64: 2>, scalar_prefetch = 0 : i64, scratch_operands = 0 : i64, tpu.core_type = #tpu.core_type<tc>, window_params = [{transform_indices = @transform_0, window_bounds = array<i64: 1, 64, 32>}, {pipeline_mode = #tpu.pipeline_mode<synchronous>, transform_indices = @transform_1, window_bounds = array<i64: 4, 32, 8>}, {pipeline_mode = #tpu.pipeline_mode<synchronous>, transform_indices = @transform_2, window_bounds = array<i64: 4, 32, 8>}, {pipeline_mode = #tpu.pipeline_mode<synchronous>, transform_indices = @transform_3, window_bounds = array<i64: 4, 32, 8>}, {pipeline_mode = #tpu.pipeline_mode<synchronous>, transform_indices = @transform_4, window_bounds = array<i64: 4, 8, 32>}, {pipeline_mode = #tpu.pipeline_mode<synchronous>, transform_indices = @transform_5, window_bounds = array<i64: 1, 32>}, {transform_indices = @transform_6, window_bounds = array<i64: 1, 64, 32>}]} {
    %c0 = arith.constant 0 : index
    %c0_0 = arith.constant 0 : index
    %c0_1 = arith.constant 0 : index
    %0 = vector.load %arg1[%c0, %c0_0, %c0_1] : memref<1x64x32xbf16, #tpu.memory_space<vmem>>, vector<1x64x32xbf16>
    %1 = vector.shape_cast %0 : vector<1x64x32xbf16> to vector<64x32xbf16>
    %c0_2 = arith.constant 0 : index
    %c0_3 = arith.constant 0 : index
    %2 = vector.load %arg6[%c0_2, %c0_3] : memref<1x32xf32, #tpu.memory_space<vmem>>, vector<1x32xf32>
    %3 = vector.shape_cast %2 : vector<1x32xf32> to vector<1x32xf32>
    %4 = vector.broadcast %3 : vector<1x32xf32> to vector<64x32xf32>
    %c0_4 = arith.constant 0 : index
    %c0_5 = arith.constant 0 : index
    %c0_6 = arith.constant 0 : index
    %5 = vector.load %arg7[%c0_4, %c0_5, %c0_6] : memref<1x64x32xf32, #tpu.memory_space<vmem>>, vector<1x64x32xf32>
    %6 = vector.shape_cast %5 : vector<1x64x32xf32> to vector<64x32xf32>
    %7 = vector.shape_cast %4 : vector<64x32xf32> to vector<1x64x32xf32>
    tpu.vector_store %arg7[%c0_4, %c0_5, %c0_6], %7 {strides = array<i32>} : memref<1x64x32xf32, #tpu.memory_space<vmem>>, vector<1x64x32xf32>,
    %c0_i32 = arith.constant 0 : i32
    %c4_i32 = arith.constant 4 : i32
    %8 = arith.addi %c0_i32, %c4_i32 : i32
    %c1_i32 = arith.constant 1 : i32
    scf.for %arg8 = %c0_i32 to %8 step %c1_i32  : i32 {
      %c1_i32_8 = arith.constant 1 : i32
      %9 = arith.muli %arg8, %c1_i32_8 : i32
      %c0_i32_9 = arith.constant 0 : i32
      %10 = arith.addi %c0_i32_9, %9 : i32
      %11 = arith.index_cast %10 : i32 to index
      %c0_10 = arith.constant 0 : index
      %c0_11 = arith.constant 0 : index
      %12 = vector.load %arg2[%11, %c0_10, %c0_11] : memref<4x32x8xbf16, #tpu.memory_space<vmem>>, vector<1x32x8xbf16>
      %13 = vector.shape_cast %12 : vector<1x32x8xbf16> to vector<32x8xbf16>
      %cst = arith.constant dense<0.000000e+00> : vector<64x8xf32>
      %14 = tpu.matmul %1, %13, %cst {dimension_numbers = #tpu.dot_dimension_numbers<[1], [0], [0], [1], [0, 0, 1, 1], [], []>} : vector<64x32xbf16>, vector<32x8xbf16>, vector<64x8xf32> -> vector<64x8xf32>
      %15 = arith.index_cast %10 : i32 to index
      %c0_12 = arith.constant 0 : index
      %c0_13 = arith.constant 0 : index
      %16 = vector.load %arg3[%15, %c0_12, %c0_13] : memref<4x32x8xbf16, #tpu.memory_space<vmem>>, vector<1x32x8xbf16>
      %17 = vector.shape_cast %16 : vector<1x32x8xbf16> to vector<32x8xbf16>
      %cst_14 = arith.constant dense<0.000000e+00> : vector<64x8xf32>
      %18 = tpu.matmul %1, %17, %cst_14 {dimension_numbers = #tpu.dot_dimension_numbers<[1], [0], [0], [1], [0, 0, 1, 1], [], []>} : vector<64x32xbf16>, vector<32x8xbf16>, vector<64x8xf32> -> vector<64x8xf32>
      %19 = arith.index_cast %10 : i32 to index
      %c0_15 = arith.constant 0 : index
      %c0_16 = arith.constant 0 : index
      %20 = vector.load %arg4[%19, %c0_15, %c0_16] : memref<4x32x8xbf16, #tpu.memory_space<vmem>>, vector<1x32x8xbf16>
      %21 = vector.shape_cast %20 : vector<1x32x8xbf16> to vector<32x8xbf16>
      %cst_17 = arith.constant dense<0.000000e+00> : vector<64x8xf32>
      %22 = tpu.matmul %1, %21, %cst_17 {dimension_numbers = #tpu.dot_dimension_numbers<[1], [0], [0], [1], [0, 0, 1, 1], [], []>} : vector<64x32xbf16>, vector<32x8xbf16>, vector<64x8xf32> -> vector<64x8xf32>
      %23 = arith.truncf %14 : vector<64x8xf32> to vector<64x8xbf16>
      %24 = arith.truncf %18 : vector<64x8xf32> to vector<64x8xbf16>
      %cst_18 = arith.constant dense<0.000000e+00> : vector<64x64xf32>
      %25 = tpu.matmul %23, %24, %cst_18 {dimension_numbers = #tpu.dot_dimension_numbers<[1], [1], [0], [0], [0, 0, 1, 0], [], []>} : vector<64x8xbf16>, vector<64x8xbf16>, vector<64x64xf32> -> vector<64x64xf32>
      %cst_19 = arith.constant dense<0xFF800000> : vector<64xf32>
      %26 = vector.multi_reduction <maximumf>, %25, %cst_19 [1] : vector<64x64xf32> to vector<64xf32>
      %27 = vector.shape_cast %26 : vector<64xf32> to vector<64x1xf32>
      %28 = vector.broadcast %27 : vector<64x1xf32> to vector<64x64xf32>
      %29 = arith.subf %25, %28 : vector<64x64xf32>
      %30 = math.exp %29 : vector<64x64xf32>
      %cst_20 = arith.constant dense<0.000000e+00> : vector<64xf32>
      %31 = vector.multi_reduction <add>, %30, %cst_20 [1] : vector<64x64xf32> to vector<64xf32>
      %32 = vector.shape_cast %31 : vector<64xf32> to vector<64x1xf32>
      %33 = tpu.reciprocal %32 {approx = true} : vector<64x1xf32> -> vector<64x1xf32>
      %34 = vector.broadcast %33 : vector<64x1xf32> to vector<64x64xf32>
      %35 = arith.mulf %30, %34 : vector<64x64xf32>
      %36 = arith.truncf %35 : vector<64x64xf32> to vector<64x64xbf16>
      %37 = arith.truncf %22 : vector<64x8xf32> to vector<64x8xbf16>
      %cst_21 = arith.constant dense<0.000000e+00> : vector<64x8xf32>
      %38 = tpu.matmul %36, %37, %cst_21 {dimension_numbers = #tpu.dot_dimension_numbers<[1], [0], [0], [1], [0, 0, 1, 1], [], []>} : vector<64x64xbf16>, vector<64x8xbf16>, vector<64x8xf32> -> vector<64x8xf32>
      %c0_22 = arith.constant 0 : index
      %c0_23 = arith.constant 0 : index
      %c0_24 = arith.constant 0 : index
      %39 = vector.load %arg7[%c0_22, %c0_23, %c0_24] : memref<1x64x32xf32, #tpu.memory_space<vmem>>, vector<1x64x32xf32>
      %40 = vector.shape_cast %39 : vector<1x64x32xf32> to vector<64x32xf32>
      %41 = arith.truncf %38 : vector<64x8xf32> to vector<64x8xbf16>
      %42 = arith.index_cast %10 : i32 to index
      %c0_25 = arith.constant 0 : index
      %c0_26 = arith.constant 0 : index
      %43 = vector.load %arg5[%42, %c0_25, %c0_26] : memref<4x8x32xbf16, #tpu.memory_space<vmem>>, vector<1x8x32xbf16>
      %44 = vector.shape_cast %43 : vector<1x8x32xbf16> to vector<8x32xbf16>
      %cst_27 = arith.constant dense<0.000000e+00> : vector<64x32xf32>
      %45 = tpu.matmul %41, %44, %cst_27 {dimension_numbers = #tpu.dot_dimension_numbers<[1], [0], [0], [1], [0, 0, 1, 1], [], []>} : vector<64x8xbf16>, vector<8x32xbf16>, vector<64x32xf32> -> vector<64x32xf32>
      %46 = arith.addf %40, %45 : vector<64x32xf32>
      %c0_28 = arith.constant 0 : index
      %c0_29 = arith.constant 0 : index
      %c0_30 = arith.constant 0 : index
      %47 = vector.load %arg7[%c0_28, %c0_29, %c0_30] : memref<1x64x32xf32, #tpu.memory_space<vmem>>, vector<1x64x32xf32>
      %48 = vector.shape_cast %47 : vector<1x64x32xf32> to vector<64x32xf32>
      %49 = vector.shape_cast %46 : vector<64x32xf32> to vector<1x64x32xf32>
      tpu.vector_store %arg7[%c0_28, %c0_29, %c0_30], %49 {strides = array<i32>} : memref<1x64x32xf32, #tpu.memory_space<vmem>>, vector<1x64x32xf32>,
    }
    %c4_i32_7 = arith.constant 4 : i32
    return
  }
  func.func @transform_0(%arg0: i32) -> (i32, i32, i32) {
    %c0_i32 = arith.constant 0 : i32
    %c0_i32_0 = arith.constant 0 : i32
    %c0_i32_1 = arith.constant 0 : i32
    return %arg0, %c0_i32, %c0_i32_0 : i32, i32, i32
  }
  func.func @transform_1(%arg0: i32) -> (i32, i32, i32) {
    %c0_i32 = arith.constant 0 : i32
    %c0_i32_0 = arith.constant 0 : i32
    %c0_i32_1 = arith.constant 0 : i32
    %c0_i32_2 = arith.constant 0 : i32
    return %c0_i32, %c0_i32_0, %c0_i32_1 : i32, i32, i32
  }
  func.func @transform_2(%arg0: i32) -> (i32, i32, i32) {
    %c0_i32 = arith.constant 0 : i32
    %c0_i32_0 = arith.constant 0 : i32
    %c0_i32_1 = arith.constant 0 : i32
    %c0_i32_2 = arith.constant 0 : i32
    return %c0_i32, %c0_i32_0, %c0_i32_1 : i32, i32, i32
  }
  func.func @transform_3(%arg0: i32) -> (i32, i32, i32) {
    %c0_i32 = arith.constant 0 : i32
    %c0_i32_0 = arith.constant 0 : i32
    %c0_i32_1 = arith.constant 0 : i32
    %c0_i32_2 = arith.constant 0 : i32
    return %c0_i32, %c0_i32_0, %c0_i32_1 : i32, i32, i32
  }
  func.func @transform_4(%arg0: i32) -> (i32, i32, i32) {
    %c0_i32 = arith.constant 0 : i32
    %c0_i32_0 = arith.constant 0 : i32
    %c0_i32_1 = arith.constant 0 : i32
    %c0_i32_2 = arith.constant 0 : i32
    return %c0_i32, %c0_i32_0, %c0_i32_1 : i32, i32, i32
  }
  func.func @transform_5(%arg0: i32) -> (i32, i32) {
    %c0_i32 = arith.constant 0 : i32
    %c0_i32_0 = arith.constant 0 : i32
    %c0_i32_1 = arith.constant 0 : i32
    return %c0_i32, %c0_i32_0 : i32, i32
  }
  func.func @transform_6(%arg0: i32) -> (i32, i32, i32) {
    %c0_i32 = arith.constant 0 : i32
    %c0_i32_0 = arith.constant 0 : i32
    %c0_i32_1 = arith.constant 0 : i32
    return %arg0, %c0_i32, %c0_i32_0 : i32, i32, i32
  }
}

</mosaic_0001>

<bundles_post_ra>
// kernel: tpu_custom_call.1
= control target key start
LH: loop header
LB: loop body
LE: loop exit
PB: predicated region body
PF: predicated region fallthrough
CT: control target
= control target key end

     0   :  { %s1304_s21 = smov 0   ;;  %s1475_s0 = inlined_call_operand.vmem [shape: bf16[2,64,32], index: 0, kind: input, shape index: {}]   ;;  %s1476_s1 = inlined_call_operand.vmem [shape: bf16[4,32,8], index: 1, kind: input, shape index: {}]   ;;  %s1477_s2 = inlined_call_operand.vmem [shape: bf16[4,32,8], index: 2, kind: input, shape index: {}]   ;;  %s1478_s3 = inlined_call_operand.vmem [shape: bf16[4,32,8], index: 3, kind: input, shape index: {}]   ;;  %s1479_s4 = inlined_call_operand.vmem [shape: bf16[4,8,32], index: 4, kind: input, shape index: {}]   ;;  %s1480_s5 = inlined_call_operand.vmem [shape: f32[1,32], index: 5, kind: input, shape index: {}]   ;;  %s1481_s6 = inlined_call_operand.vmem [shape: f32[2,64,32], index: 6, kind: output, shape index: {}]  }
   0x1 LB: > { %s1017_s22 = sadd.s32 4294967295, %s1263_s21   ;;  %p1021_p0 = scmp.ge.s32.totalorder %s1263_s21, 1  ;;  %s1263_s21 = sphi %s1304_s21, %s16_s21  }
   0x2   : > { %p212_p1 = scmp.lt.s32.totalorder %s1263_s21, 3 }
   0x4   : > { %p213_p2 = pnand %p1021_p0, %p212_p1 }
   0x5   : > { %p242_p3 = scmp.lt.s32.totalorder (!%p213_p2), %s1017_s22, 1  ;;  %s1355_s9 = smov (!%p213_p2), 0  }
   0x6   : > { %216 = sbr.rel (%p213_p2) target bundleno = 1207 (0x4b7), region = 44 }
   0xb   : > { %s1483_s22 = smov (!%p242_p3, %s1017_s22), 1  ;;  %v1026_v0 = vld [vmem:[%s1480_s5] ss:$0 sm:$0xff]  ;;  %vm268_vm0 = vcmask 261120  }
   0xc   : > { %s1068_s25 = sshll.u32 %s1483_s22, 5  ;;  %s1069_s26 = sshll.u32 %s1483_s22, 6 }
   0xd   : > { %s246_s29 = scalar_lea.vmem %s1475_s0, %s1068_s25  ;;  %s1321_s8 = scalar_lea.vmem %s1481_s6, %s1069_s26 }
   0xe   : > { %v1323_v1 = vld [vmem:[%s246_s29] sm:$0xf]  ;;  %v1325_v2 = vld [vmem:[%s246_s29 + $0x4] sm:$0xf]  ;;  %v1327_v3 = vld [vmem:[%s246_s29 + $0x8] sm:$0xf] }
   0xf   : > { %269 = vst.msk [vmem:[%s1321_s8] sm:$0xff] %vm268_vm0, %v1026_v0  ;;  %270 = vst.msk [vmem:[%s1321_s8 + $0x8] sm:$0xff] %vm268_vm0, %v1026_v0  ;;  %v1345_v4 = vld [vmem:[%s246_s29 + $0xc] sm:$0xf]  ;;  %v1347_v5 = vld [vmem:[%s246_s29 + $0x10] sm:$0xf] }
  0x10   : > { %271 = vst.msk [vmem:[%s1321_s8 + $0x10] sm:$0xff] %vm268_vm0, %v1026_v0  ;;  %272 = vst.msk [vmem:[%s1321_s8 + $0x18] sm:$0xff] %vm268_vm0, %v1026_v0  ;;  %v1349_v6 = vld [vmem:[%s246_s29 + $0x14] sm:$0xf]  ;;  %v1351_v7 = vld [vmem:[%s246_s29 + $0x18] sm:$0xf] }
  0x11   : > { %273 = vst.msk [vmem:[%s1321_s8 + $0x20] sm:$0xff] %vm268_vm0, %v1026_v0  ;;  %274 = vst.msk [vmem:[%s1321_s8 + $0x28] sm:$0xff] %vm268_vm0, %v1026_v0  ;;  %v1353_v8 = vld [vmem:[%s246_s29 + $0x1c] sm:$0xf] }
  0x12   : > { %275 = vst.msk [vmem:[%s1321_s8 + $0x30] sm:$0xff] %vm268_vm0, %v1026_v0  ;;  %276 = vst.msk [vmem:[%s1321_s8 + $0x38] sm:$0xff] %vm268_vm0, %v1026_v0 }
  0x13 LB: >> { %v1362_v9 = vcombine.low %v1347_v5, %v1349_v6  ;;  %v1029_v10 = vcombine.low %v1323_v1, %v1325_v2  ;;  %s1367_s10 = sshll.u32 %s1267_s9, 4  ;;  %v1382_v14 = vcombine.low %v1351_v7, %v1353_v8  ;;  %v1030_v16 = vcombine.low %v1327_v3, %v1345_v4  ;;  %s1061_s20 = sshll.u32 %s1267_s9, 2  ;;  %s1267_s9 = sphi %s1355_s9, %s282_s9  }
  0x14   : >> { %s285_s13 = scalar_lea.vmem %s1476_s1, %s1367_s10  ;;  %s400_s16 = scalar_lea.vmem %s1477_s2, %s1367_s10  ;;  %vm573_vm1 = vcmask 64512   ;;  %vm663_vm2 = vcmask 523264   ;;  %vm864_vm3 = vcmask 1043456  }
  0x15   : >> { %1120 = vmatprep.mubr.msk.bf16.mxu1 %vm268_vm0, %v1362_v9  ;;  %1116 = vmatprep.mubr.msk.bf16.mxu0 %vm268_vm0, %v1029_v10  ;;  %v1215_v11 = vld [vmem:[%s285_s13 + $0x8] sm:$0xff]   ;;  %v1216_v12 = vld [vmem:[%s285_s13] sm:$0xff]   ;;  %s483_s19 = scalar_lea.vmem %s1478_s3, %s1367_s10  ;;  %s850_s24 = scalar_lea.vmem %s1479_s4, %s1061_s20 }
  0x16   : >> { %1190 = vmatprep.subr.bf16.mxu1 %v1215_v11  ;;  %1112 = vmatprep.subr.bf16.mxu0 %v1215_v11  ;;  %v1217_v13 = vld [vmem:[%s400_s16 + $0x8] sm:$0xff]   ;;  %v1218_v15 = vld [vmem:[%s400_s16] sm:$0xff]   ;;  %s282_s9 = sadd.s32 1, %s1267_s9  }
  0x17   : >> { %1192 = vmatpush3.bf16.msra.mxu1 %v1215_v11  ;;  %1113 = vmatpush3.bf16.msra.mxu0 %v1215_v11  ;;  %v1219_v45 = vld [vmem:[%s483_s19 + $0x8] sm:$0xff]   ;;  %v1220_v46 = vld [vmem:[%s483_s19] sm:$0xff]   ;;  %p279_p4 = scmp.ge.s32.totalorder %s282_s9, 4  }
  0x18   : >> { %1191 = vmatprep.subr.bf16.mxu1 %v1216_v12  ;;  %1114 = vmatprep.subr.bf16.mxu0 %v1216_v12 }
  0x1b   : >> { %1193 = vmatpush3.bf16.msra.mxu1 %v1216_v12  ;;  %1115 = vmatpush3.bf16.msra.mxu0 %v1216_v12 }
  0x1c   : >> { %1124 = vmatprep.subr.bf16.mxu1 %v1217_v13  ;;  %1136 = vmatprep.subr.bf16.mxu0 %v1219_v45 }
  0x1e   : >> { %1121 = vmatmul.mubr.msk.bf16.vlgmr.msra.gmra.mxu1 %vm268_vm0, %v1382_v14  ;;  %1117 = vmatmul.mubr.msk.bf16.vlgmr.msra.gmra.mxu0 %vm268_vm0, %v1030_v16 }
  0x1f   : >> { %1125 = vmatpush3.bf16.msra.mxu1 %v1217_v13  ;;  %1128 = vmatprep.mubr.msk.bf16.mxu1 %vm268_vm0, %v1029_v10 }
  0x20   : >> { %1126 = vmatprep.subr.bf16.mxu1 %v1218_v15  ;;  %1140 = vmatprep.mubr.msk.bf16.mxu0 %vm268_vm0, %v1029_v10 }
  0x21   : >> { %1137 = vmatpush3.bf16.msra.mxu0 %v1219_v45 }
  0x22   : >> { %1138 = vmatprep.subr.bf16.mxu0 %v1220_v46 }
  0x23   : >> { %1127 = vmatpush3.bf16.msra.mxu1 %v1218_v15 }
  0x25   : >> { %1139 = vmatpush3.bf16.msra.mxu0 %v1220_v46 }
  0x26   : >> { %1129 = vmatmul.mubr.msk.bf16.vlgmr.msra.gmra.mxu1 %vm268_vm0, %v1030_v16 }
  0x27   : >> { %1132 = vmatprep.mubr.msk.bf16.mxu1 %vm268_vm0, %v1362_v9 }
  0x28   : >> { %1141 = vmatmul.mubr.msk.bf16.vlgmr.msra.gmra.mxu0 %vm268_vm0, %v1030_v16 }
  0x29   : >> { %1144 = vmatprep.mubr.msk.bf16.mxu0 %vm268_vm0, %v1362_v9 }
  0x2e   : >> { %1133 = vmatmul.mubr.msk.bf16.gmra.mxu1 %vm268_vm0, %v1382_v14 }
  0x30   : >> { %1145 = vmatmul.mubr.msk.bf16.gmra.mxu0 %vm268_vm0, %v1382_v14 }
  0xde   : >> { %v1122_v17 = vpop.f32.mrf.mxu1  ;;  %v1118_v18 = vpop.f32.mrf.mxu0 }
  0xe0   : >> { %v384_v19 = vpop.f32.mrf.mxu1  ;;  %v368_v20 = vpop.f32.mrf.mxu0 }
  0xe2   : >> { %v1123_v21 = vpop.f32.mrf.mxu1  ;;  %v1119_v22 = vpop.f32.mrf.mxu0 }
  0xe3   : >> { %v566_v42 = vpack.c.bf16 %v1119_v22, %v1118_v18  ;;  %v568_v44 = vpack.c.bf16 %v1123_v21, %v1122_v17 }
  0xe4   : >> { %v387_v23 = vpop.f32.mrf.mxu1  ;;  %v371_v24 = vpop.f32.mrf.mxu0 }
  0xe5   : >> { %v565_v25 = vpack.c.bf16 %v371_v24, %v368_v20  ;;  %v567_v43 = vpack.c.bf16 %v387_v23, %v384_v19 }
  0xe6   : >> { %v1130_v26 = vpop.f32.mrf.mxu1 }
  0xe7   : >> { %1156 = vmatprep.mubr.msk.bf16.mxu1 %vm573_vm1, %v565_v25 }
  0xe8   : >> { %v451_v27 = vpop.f32.mrf.mxu1  ;;  %v1142_v63 = vpop.f32.mrf.mxu0 }
  0xea   : >> { %v1131_v28 = vpop.f32.mrf.mxu1  ;;  %v534_v0 = vpop.f32.mrf.mxu0 }
  0xeb   : >> { %v570_v37 = vpack.c.bf16 %v1131_v28, %v1130_v26 }
  0xec   : >> { %v454_v29 = vpop.f32.mrf.mxu1  ;;  %v1143_v9 = vpop.f32.mrf.mxu0 }
  0xed   : >> { %v590_v39 = vsel %vm573_vm1, %v570_v37, 0  ;;  %v569_v40 = vpack.c.bf16 %v454_v29, %v451_v27  ;;  %v757_v17 = vpack.c.bf16 %v1143_v9, %v1142_v63 }
  0xee   : >> { %v1134_v30 = vpop.f32.mrf.mxu1  ;;  %v537_v10 = vpop.f32.mrf.mxu0 }
  0xef   : >> { %v587_v41 = vsel %vm573_vm1, %v569_v40, 0  ;;  %v756_v18 = vpack.c.bf16 %v537_v10, %v534_v0 }
  0xf0   : >> { %v467_v31 = vpop.f32.mrf.mxu1  ;;  %v1146_v11 = vpop.f32.mrf.mxu0 }
  0xf2   : >> { %v1135_v32 = vpop.f32.mrf.mxu1  ;;  %v550_v12 = vpop.f32.mrf.mxu0 }
  0xf3   : >> { %v572_v33 = vpack.c.bf16 %v1135_v32, %v1134_v30 }
  0xf4   : >> { %v470_v34 = vpop.f32.mrf.mxu1  ;;  %v1147_v13 = vpop.f32.mrf.mxu0 }
  0xf5   : >> { %v596_v35 = vsel %vm573_vm1, %v572_v33, 0  ;;  %v571_v36 = vpack.c.bf16 %v470_v34, %v467_v31  ;;  %1194 = vmatprep.subr.msk.bf16.mxu1 %vm573_vm1, %v572_v33  ;;  %v759_v14 = vpack.c.bf16 %v1147_v13, %v1146_v11 }
  0xf6   : >> { %1149 = vmatpush3.bf16.xpose.msra.mxu1 %v596_v35  ;;  %v553_v15 = vpop.f32.mrf.mxu0 }
  0xf7   : >> { %1195 = vmatprep.subr.msk.bf16.mxu1 %vm573_vm1, %v571_v36  ;;  %v593_v38 = vsel %vm573_vm1, %v571_v36, 0  ;;  %1164 = vmatprep.subr.bf16.mxu0 %v759_v14  ;;  %v758_v16 = vpack.c.bf16 %v553_v15, %v550_v12 }
  0xf8   : >> { %1165 = vmatpush3.bf16.msra.mxu0 %v759_v14 }
  0xf9   : >> { %1166 = vmatprep.subr.bf16.mxu0 %v758_v16 }
  0xfc   : >> { %1167 = vmatpush3.bf16.msra.mxu0 %v758_v16 }
  0xfd   : >> { %1168 = vmatprep.subr.bf16.mxu0 %v757_v17 }
  0xfe   : >> { %1151 = vmatpush3.bf16.xpose.msra.mxu1 %v593_v38 }
  0xff   : >> { %1196 = vmatprep.subr.msk.bf16.mxu1 %vm573_vm1, %v570_v37 }
 0x100   : >> { %1169 = vmatpush3.bf16.msra.mxu0 %v757_v17 }
 0x101   : >> { %1170 = vmatprep.subr.bf16.mxu0 %v756_v18 }
 0x104   : >> { %1171 = vmatpush3.bf16.msra.mxu0 %v756_v18 }
 0x106   : >> { %1153 = vmatpush3.bf16.xpose.msra.mxu1 %v590_v39 }
 0x107   : >> { %1197 = vmatprep.subr.msk.bf16.mxu1 %vm573_vm1, %v569_v40 }
 0x10e   : >> { %1155 = vmatpush3.bf16.xpose.msra.mxu1 %v587_v41 }
 0x115   : >> { %1157 = vmatmul.mubr.msk.bf16.vlgmr.msra.gmra.mxu1 %vm573_vm1, %v566_v42 }
 0x116   : >> { %1160 = vmatprep.mubr.msk.bf16.mxu1 %vm573_vm1, %v567_v43 }
 0x11d   : >> { %1161 = vmatmul.mubr.msk.bf16.gmra.mxu1 %vm573_vm1, %v568_v44 }
 0x1d5   : >> { %v1158_v47 = vpop.f32.mrf.mxu1 }
 0x1d6   : >> { %v670_v48 = vsel %vm663_vm2, %v1158_v47, -inf }
 0x1d7   : >> { %671 = vmax.xlane.f32.xlu1 %v670_v48  ;;  %v632_v49 = vpop.f32.mrf.mxu1 }
 0x1d8   : >> { %v664_v50 = vsel %vm663_vm2, %v632_v49, -inf }
 0x1d9   : >> { %665 = vmax.xlane.f32.xlu0 %v664_v50  ;;  %v1159_v51 = vpop.f32.mrf.mxu1 }
 0x1da   : >> { %v673_v52 = vsel %vm663_vm2, %v1159_v51, -inf }
 0x1db   : >> { %674 = vmax.xlane.f32.xlu1 %v673_v52  ;;  %v635_v53 = vpop.f32.mrf.mxu1 }
 0x1dc   : >> { %v667_v54 = vsel %vm663_vm2, %v635_v53, -inf }
 0x1dd   : >> { %668 = vmax.xlane.f32.xlu0 %v667_v54  ;;  %v1162_v55 = vpop.f32.mrf.mxu1 }
 0x1de   : >> { %v682_v60 = vsel %vm663_vm2, %v1162_v55, -inf }
 0x1df   : >> { %v648_v56 = vpop.f32.mrf.mxu1 }
 0x1e0   : >> { %v676_v57 = vsel %vm663_vm2, %v648_v56, -inf }
 0x1e1   : >> { %677 = vmax.xlane.f32.xlu0 %v676_v57  ;;  %v1163_v58 = vpop.f32.mrf.mxu1 }
 0x1e2   : >> { %v685_v62 = vsel %vm663_vm2, %v1163_v58, -inf }
 0x1e3   : >> { %v651_v59 = vpop.f32.mrf.mxu1 }
 0x1e4   : >> { %v679_v61 = vsel %vm663_vm2, %v651_v59, -inf }
 0x1e5   : >> { %683 = vmax.xlane.f32.xlu0 %v682_v60  ;;  %680 = vmax.xlane.f32.xlu1 %v679_v61 }
 0x1e9   : >> { %686 = vmax.xlane.f32.xlu1 %v685_v62 }
 0x260   : >> { %v672_v19 = vpop.xlane.xlu1 %671 }
 0x261   : >> { %v690_v20 = vsub.f32 %v1158_v47, %v672_v19 }
 0x262   : >> { %v666_v21 = vpop.xlane.xlu0 %665 }
 0x263   : >> { %v688_v22 = vsub.f32 %v632_v49, %v666_v21  ;;  %v700_v24 = vmul.f32 1.442695, %v690_v20 }
 0x264   : >> { %v675_v23 = vpop.xlane.xlu1 %674 }
 0x265   : >> { %v696_v25 = vmul.f32 1.442695, %v688_v22  ;;  %v691_v26 = vsub.f32 %v1159_v51, %v675_v23 }
 0x266   : >> { %v669_v27 = vpop.xlane.xlu0 %668 }
 0x267   : >> { %1221 = vpow2.f32 %v696_v25  ;;  %v689_v28 = vsub.f32 %v635_v53, %v669_v27  ;;  %v702_v29 = vmul.f32 1.442695, %v691_v26 }
 0x268   : >> { %1223 = vpow2.f32 %v700_v24 }
 0x269   : >> { %v698_v30 = vmul.f32 1.442695, %v689_v28 }
 0x26a   : >> { %v678_v31 = vpop.xlane.xlu0 %677 }
 0x26b   : >> { %1225 = vpow2.f32 %v698_v30  ;;  %v692_v32 = vsub.f32 %v648_v56, %v678_v31 }
 0x26c   : >> { %1227 = vpow2.f32 %v702_v29 }
 0x26d   : >> { %v704_v33 = vmul.f32 1.442695, %v692_v32 }
 0x26e   : >> { %v684_v34 = vpop.xlane.xlu0 %683  ;;  %v681_v35 = vpop.xlane.xlu1 %680 }
 0x26f   : >> { %1229 = vpow2.f32 %v704_v33  ;;  %v694_v36 = vsub.f32 %v1162_v55, %v684_v34  ;;  %v693_v37 = vsub.f32 %v651_v59, %v681_v35  ;;  %v851_v59 = vld [vmem:[%s850_s24] sm:$0xf] }
 0x270   : >> { %1198 = vmatprep.subr.msk.bf16.mxu0 %vm864_vm3, %v851_v59  ;;  %v866_v60 = vsel %vm864_vm3, %v851_v59, 0  ;;  %v841_v59 = vld [vmem:[%s1321_s8 + $0x20] sm:$0xff] }
 0x271   : >> { %v708_v38 = vmul.f32 1.442695, %v694_v36  ;;  %v706_v39 = vmul.f32 1.442695, %v693_v37 }
 0x272   : >> { %v687_v40 = vpop.xlane.xlu1 %686 }
 0x273   : >> { %1231 = vpow2.f32 %v708_v38  ;;  %v695_v41 = vsub.f32 %v1163_v58, %v687_v40 }
 0x274   : >> { %v1222_v42 = vpop.eup %1221  ;;  %1233 = vpow2.f32 %v706_v39 }
 0x275   : >> { %v710_v43 = vmul.f32 1.442695, %v695_v41  ;;  %v712_v44 = vsel %vm663_vm2, %v1222_v42, 0.0  ;;  %v1224_v45 = vpop.eup %1223 }
 0x276   : >> { %713 = vadd.xlane.f32.xlu0 %v712_v44  ;;  %v718_v47 = vsel %vm663_vm2, %v1224_v45, 0.0 }
 0x277   : >> { %1235 = vpow2.f32 %v710_v43 }
 0x278   : >> { %v1226_v46 = vpop.eup %1225 }
 0x279   : >> { %v715_v48 = vsel %vm663_vm2, %v1226_v46, 0.0  ;;  %v1228_v49 = vpop.eup %1227 }
 0x27a   : >> { %719 = vadd.xlane.f32.xlu0 %v718_v47  ;;  %716 = vadd.xlane.f32.xlu1 %v715_v48  ;;  %v721_v52 = vsel %vm663_vm2, %v1228_v49, 0.0  ;;  %v837_v47 = vld [vmem:[%s1321_s8] sm:$0xff] }
 0x27c   : >> { %v1230_v50 = vpop.eup %1229 }
 0x27d   : >> { %v724_v51 = vsel %vm663_vm2, %v1230_v50, 0.0 }
 0x27e   : >> { %725 = vadd.xlane.f32.xlu0 %v724_v51  ;;  %722 = vadd.xlane.f32.xlu1 %v721_v52 }
 0x280   : >> { %v1232_v53 = vpop.eup %1231 }
 0x281   : >> { %v1234_v54 = vpop.eup %1233  ;;  %v730_v55 = vsel %vm663_vm2, %v1232_v53, 0.0 }
 0x282   : >> { %731 = vadd.xlane.f32.xlu0 %v730_v55  ;;  %v727_v56 = vsel %vm663_vm2, %v1234_v54, 0.0 }
 0x283   : >> { %728 = vadd.xlane.f32.xlu1 %v727_v56  ;;  %v843_v56 = vld [vmem:[%s1321_s8 + $0x30] sm:$0xff] }
 0x284   : >> { %v1236_v57 = vpop.eup %1235 }
 0x285   : >> { %v733_v58 = vsel %vm663_vm2, %v1236_v57, 0.0 }
 0x287   : >> { %734 = vadd.xlane.f32.xlu1 %v733_v58 }
 0x2ff   : >> { %v714_v61 = vpop.xlane.xlu0 %713 }
 0x300   : >> { %1237 = vrcp.f32 %v714_v61 }
 0x303   : >> { %v720_v62 = vpop.xlane.xlu0 %719  ;;  %v717_v63 = vpop.xlane.xlu1 %716 }
 0x304   : >> { %1239 = vrcp.f32 %v717_v63 }
 0x305   : >> { %1241 = vrcp.f32 %v720_v62  ;;  %v844_v62 = vld [vmem:[%s1321_s8 + $0x38] sm:$0xff] }
 0x307   : >> { %v726_v0 = vpop.xlane.xlu0 %725  ;;  %v723_v9 = vpop.xlane.xlu1 %722 }
 0x308   : >> { %1243 = vrcp.f32 %v723_v9  ;;  %v842_v9 = vld [vmem:[%s1321_s8 + $0x28] sm:$0xff] }
 0x309   : >> { %1245 = vrcp.f32 %v726_v0 }
 0x30b   : >> { %v732_v10 = vpop.xlane.xlu0 %731 }
 0x30c   : >> { %v729_v11 = vpop.xlane.xlu1 %728 }
 0x30d   : >> { %1247 = vrcp.f32 %v729_v11  ;;  %v1238_v12 = vpop.eup %1237 }
 0x30e   : >> { %1249 = vrcp.f32 %v732_v10  ;;  %v744_v15 = vmul.f32 %v1238_v12, %v1222_v42 }
 0x310   : >> { %v735_v13 = vpop.xlane.xlu1 %734 }
 0x311   : >> { %1251 = vrcp.f32 %v735_v13  ;;  %v1240_v14 = vpop.eup %1239 }
 0x312   : >> { %v745_v16 = vmul.f32 %v1240_v14, %v1226_v46  ;;  %v1242_v17 = vpop.eup %1241 }
 0x313   : >> { %v746_v20 = vmul.f32 %v1242_v17, %v1224_v45  ;;  %v839_v45 = vld [vmem:[%s1321_s8 + $0x10] sm:$0xff] }
 0x314   : >> { %v752_v18 = vpack.c.bf16 %v745_v16, %v744_v15 }
 0x315   : >> { %v1244_v19 = vpop.eup %1243 }
 0x316   : >> { %v747_v21 = vmul.f32 %v1244_v19, %v1228_v49  ;;  %1172 = vmatprep.mubr.msk.bf16.mxu0 %vm663_vm2, %v752_v18  ;;  %v1246_v22 = vpop.eup %1245 }
 0x317   : >> { %v748_v25 = vmul.f32 %v1246_v22, %v1230_v50  ;;  %v840_v50 = vld [vmem:[%s1321_s8 + $0x18] sm:$0xff] }
 0x318   : >> { %v753_v23 = vpack.c.bf16 %v747_v21, %v746_v20 }
 0x31a   : >> { %v1248_v24 = vpop.eup %1247  ;;  %1173 = vmatmul.mubr.msk.bf16.vlgmr.msra.gmra.mxu0 %vm663_vm2, %v753_v23 }
 0x31b   : >> { %v749_v26 = vmul.f32 %v1248_v24, %v1234_v54  ;;  %v1250_v27 = vpop.eup %1249  ;;  %1181 = vmatpush3.bf16.msra.mxu0 %v866_v60 }
 0x31c   : >> { %v750_v30 = vmul.f32 %v1250_v27, %v1232_v53  ;;  %v838_v53 = vld [vmem:[%s1321_s8 + $0x8] sm:$0xff] }
 0x31d   : >> { %v754_v28 = vpack.c.bf16 %v749_v26, %v748_v25 }
 0x31e   : >> { %v1252_v29 = vpop.eup %1251 }
 0x31f   : >> { %1176 = vmatprep.mubr.msk.bf16.mxu0 %vm663_vm2, %v754_v28  ;;  %v751_v31 = vmul.f32 %v1252_v29, %v1236_v57 }
 0x321   : >> { %v755_v32 = vpack.c.bf16 %v751_v31, %v750_v30 }
 0x323   : >> { %1177 = vmatmul.mubr.msk.bf16.gmra.mxu0 %vm663_vm2, %v755_v32 }
 0x3da   : >> { %v1174_v33 = vpop.f32.mrf.mxu0 }
 0x3dc   : >> { %v806_v34 = vpop.f32.mrf.mxu0 }
 0x3de   : >> { %v1175_v35 = vpop.f32.mrf.mxu0 }
 0x3df   : >> { %v846_v38 = vpack.c.bf16 %v1175_v35, %v1174_v33 }
 0x3e0   : >> { %v809_v36 = vpop.f32.mrf.mxu0 }
 0x3e1   : >> { %v845_v37 = vpack.c.bf16 %v809_v36, %v806_v34 }
 0x3e3   : >> { %v1178_v39 = vpop.f32.mrf.mxu0  ;;  %1182 = vmatprep.mubr.msk.bf16.mxu0 %vm573_vm1, %v845_v37 }
 0x3e4   : >> { %1183 = vmatmul.mubr.msk.bf16.vlgmr.msra.gmra.mxu0 %vm573_vm1, %v846_v38 }
 0x3e5   : >> { %v822_v40 = vpop.f32.mrf.mxu0 }
 0x3e7   : >> { %v1179_v41 = vpop.f32.mrf.mxu0 }
 0x3e8   : >> { %v848_v44 = vpack.c.bf16 %v1179_v41, %v1178_v39 }
 0x3e9   : >> { %v825_v42 = vpop.f32.mrf.mxu0 }
 0x3ea   : >> { %v847_v43 = vpack.c.bf16 %v825_v42, %v822_v40 }
 0x3ec   : >> { %1186 = vmatprep.mubr.msk.bf16.mxu0 %vm573_vm1, %v847_v43 }
 0x3ed   : >> { %1187 = vmatmul.mubr.msk.bf16.gmra.mxu0 %vm573_vm1, %v848_v44 }
 0x4a4   : >> { %v1184_v46 = vpop.f32.mrf.mxu0 }
 0x4a5   : >> { %v935_v48 = vadd.f32 %v1184_v46, %v839_v45 }
 0x4a6   : >> { %v902_v49 = vpop.f32.mrf.mxu0 }
 0x4a7   : >> { %943 = vst.msk [vmem:[%s1321_s8 + $0x10] sm:$0xff] %vm268_vm0, %v935_v48  ;;  %v933_v51 = vadd.f32 %v902_v49, %v837_v47 }
 0x4a8   : >> { %v1185_v52 = vpop.f32.mrf.mxu0 }
 0x4a9   : >> { %941 = vst.msk [vmem:[%s1321_s8] sm:$0xff] %vm268_vm0, %v933_v51  ;;  %v936_v54 = vadd.f32 %v1185_v52, %v840_v50 }
 0x4aa   : >> { %v905_v55 = vpop.f32.mrf.mxu0 }
 0x4ab   : >> { %944 = vst.msk [vmem:[%s1321_s8 + $0x18] sm:$0xff] %vm268_vm0, %v936_v54  ;;  %v934_v57 = vadd.f32 %v905_v55, %v838_v53 }
 0x4ad   : >> { %v1188_v58 = vpop.f32.mrf.mxu0  ;;  %942 = vst.msk [vmem:[%s1321_s8 + $0x8] sm:$0xff] %vm268_vm0, %v934_v57 }
 0x4ae   : >> { %v939_v60 = vadd.f32 %v1188_v58, %v843_v56 }
 0x4af   : >> { %v918_v61 = vpop.f32.mrf.mxu0 }
 0x4b0   : >> { %947 = vst.msk [vmem:[%s1321_s8 + $0x30] sm:$0xff] %vm268_vm0, %v939_v60  ;;  %v937_v63 = vadd.f32 %v918_v61, %v841_v59 }
 0x4b1   : >> { %v1189_v0 = vpop.f32.mrf.mxu0 }
 0x4b2   : >> { %945 = vst.msk [vmem:[%s1321_s8 + $0x20] sm:$0xff] %vm268_vm0, %v937_v63  ;;  %v940_v10 = vadd.f32 %v1189_v0, %v844_v62  ;;  %281 = sbr.rel (!%p279_p4) target bundleno = 19 (0x13), region = 85 }
 0x4b3   : >> { %v921_v11 = vpop.f32.mrf.mxu0 }
 0x4b4   : >> { %948 = vst.msk [vmem:[%s1321_s8 + $0x38] sm:$0xff] %vm268_vm0, %v940_v10  ;;  %v938_v12 = vadd.f32 %v921_v11, %v842_v9 }
 0x4b6   : >> { %946 = vst.msk [vmem:[%s1321_s8 + $0x28] sm:$0xff] %vm268_vm0, %v938_v12 }
 0x4b7 PF: > { %s16_s21 = sadd.s32 1, %s1263_s21  }
 0x4b8   : > { %p13_p5 = scmp.ge.s32.totalorder %s16_s21, 4  }
 0x4ba   :  { %15 = sbr.rel (!%p13_p5) target bundleno = 1 (0x1), region = 96 }

</bundles_post_ra>
